<compile_context>
chip_gen: v6e
topology: v6e:2x2x1
jax: 0.10.0
libtpu: 0.0.40
codegen_flags: <defaults>
</compile_context>

<pallas_src>
import math
import numpy as np

import jax
import jax.numpy as jnp
from jax.experimental import pallas as pl
from jax.experimental.pallas import tpu as pltpu

EPS = 1e-4


# ------------------------------------------------------------------
# Pallas kernel
# ------------------------------------------------------------------
def performer_attn_kernel(x_ref, wqt_ref, bq_ref, wkt_ref, bk_ref,
                          wvt_ref, bv_ref, projbd_ref, hmask_ref,
                          out_ref, attn_ref):
    """Two-phase grid kernel.  grid = (phase, row).

    x_ref      : (1, N, E)    bf16   row tile (pipelined over the grid)
    w*t_ref    : (E, E)       bf16   transposed Linear weights (x @ W^T == x @ w*t)
    b*_ref     : (1, E)       f32    Linear biases
    projbd_ref : (E, H*M)     bf16   block-diag (data_normalizer * proj).T per head
    hmask_ref  : (E, H*M)     bf16   block-diag ones (per-head diag broadcast)
    out_ref    : (1, N, E)    f32    output row block (lane-dense, final layout)
    attn_ref   : (H, N, N)    f32    resident accumulator == returned attn
    """
    p = pl.program_id(0)          # 0: accumulate attn over rows, 1: emit outputs
    b = pl.program_id(1)          # row (batch) index

    N, E = x_ref.shape[1], x_ref.shape[2]
    H = attn_ref.shape[0]
    M = projbd_ref.shape[1] // H
    D = E // H
    ratio = float(M) ** -0.5
    half_dn2 = 0.5 * float(D) ** -0.5      # 0.5 * data_normalizer ** 2

    x_b = x_ref[0]                          # (N, E) bf16

    @pl.when(jnp.logical_and(p == 0, b == 0))
    def _init():
        attn_ref[...] = jnp.zeros_like(attn_ref)

    @pl.when(p == 0)
    def _accumulate():
        # Fused full-width projections: (N, E) @ (E, E), bf16 in / f32 accumulate.
        q = jnp.dot(x_b, wqt_ref[...], preferred_element_type=jnp.float32) + bq_ref[...]
        k = jnp.dot(x_b, wkt_ref[...], preferred_element_type=jnp.float32) + bk_ref[...]

        # Random-feature projection for every head at once (block-diagonal
        # (E, H*M) matrix -> full contraction depth E on the MXU).
        qd = jnp.dot(q.astype(jnp.bfloat16), projbd_ref[...],
                     preferred_element_type=jnp.float32)              # (N, H*M)
        kd = jnp.dot(k.astype(jnp.bfloat16), projbd_ref[...],
                     preferred_element_type=jnp.float32)

        # Per-head 0.5 * ||.||^2 * dn^2 broadcast to that head's M feature lanes
        # via one block-diagonal-ones matmul (no per-head lane-sliced reductions).
        dq = jnp.dot((q * q).astype(jnp.bfloat16), hmask_ref[...],
                     preferred_element_type=jnp.float32) * half_dn2   # (N, H*M)
        dk = jnp.dot((k * k).astype(jnp.bfloat16), hmask_ref[...],
                     preferred_element_type=jnp.float32) * half_dn2

        # Per-head epilogue: exp feature maps + attn accumulation.  H is a small
        # static constant; slices are at multiples of M (128-aligned for
        # production feature sizes M >= 128).
        for h in range(H):
            s = slice(h * M, (h + 1) * M)
            qd_h, kd_h = qd[:, s], kd[:, s]
            qmax = jnp.max(qd_h, axis=-1, keepdims=True)              # per query row
            kmax = jnp.max(kd_h, keepdims=True)                       # per (row, head)
            qp = ratio * (jnp.exp(qd_h - dq[:, s] - qmax) + EPS)      # (N, M) f32
            kp = ratio * (jnp.exp(kd_h - dk[:, s] - kmax) + EPS)
            attn_ref[h] += jax.lax.dot_general(
                qp.astype(jnp.bfloat16), kp.astype(jnp.bfloat16),
                dimension_numbers=(((1,), (1,)), ((), ())),
                preferred_element_type=jnp.float32)                   # (N, N)

    @pl.when(p == 1)
    def _emit():
        # attn is complete (summed over all rows).  Recompute v for this row with
        # one full-width matmul (cheaper than caching a (B, N, E) VMEM scratch).
        v = jnp.dot(x_b, wvt_ref[...], preferred_element_type=jnp.float32) + bv_ref[...]
        pieces = []
        for h in range(H):
            a_h = attn_ref[h]                                         # (N, N) f32
            # Denominator == row-sum of attn  (identical to q . k_cumsum).
            d_inv = pl.reciprocal(jnp.sum(a_h, axis=-1, keepdims=True), approx=True)
            a_n = (a_h * d_inv).astype(jnp.bfloat16)
            v_h = v[:, h * D:(h + 1) * D].astype(jnp.bfloat16)        # (N, D)
            pieces.append(jnp.dot(a_n, v_h, preferred_element_type=jnp.float32))
        # Single lane-dense (N, E) store in the final layout (no wrapper transpose).
        out_ref[0] = jnp.concatenate(pieces, axis=-1)


# ------------------------------------------------------------------
# Wrapper
# ------------------------------------------------------------------
def gene_performer_attn(x, params, num_heads):
    B, N, E = x.shape
    H = num_heads
    D = E // H
    proj = params["proj"]                       # (M, D), M == nb_features == E
    M = proj.shape[0]
    dn = float(D) ** -0.25                      # data_normalizer

    # ---- one-time parameter packing (glue; hot-path math stays in the kernel) ----
    # Block-diagonal feature projection: head h's block is (dn * proj).T, so one
    # (N, E) @ (E, H*M) matmul projects every head with full contraction depth.
    projbd = jnp.kron(jnp.eye(H, dtype=jnp.float32),
                      (dn * proj).T).astype(jnp.bfloat16)             # (E, H*M)
    # Block-diagonal ones: broadcasts each head's sum(q^2) to its M feature lanes.
    hmask = jnp.kron(jnp.eye(H, dtype=jnp.float32),
                     jnp.ones((D, M), jnp.float32)).astype(jnp.bfloat16)

    x_bf = x.astype(jnp.bfloat16)
    wqt = params["wq"].T.astype(jnp.bfloat16)
    wkt = params["wk"].T.astype(jnp.bfloat16)
    wvt = params["wv"].T.astype(jnp.bfloat16)
    bq = params["bq"][None, :].astype(jnp.float32)
    bk = params["bk"][None, :].astype(jnp.float32)
    bv = params["bv"][None, :].astype(jnp.float32)

    full = lambda shape: pl.BlockSpec(shape, lambda p, b, _s=shape: (0,) * len(_s))

    in_specs = [
        pl.BlockSpec((1, N, E), lambda p, b: (b, 0, 0)),   # x : one row per step
        full((E, E)), full((1, E)),                        # Wq^T, bq
        full((E, E)), full((1, E)),                        # Wk^T, bk
        full((E, E)), full((1, E)),                        # Wv^T, bv
        full((E, H * M)),                                  # block-diag projection
        full((E, H * M)),                                  # block-diag ones
    ]
    out_specs = (
        # Phase 0 (p==0) never writes `out`; p*b keeps the block index pinned at 0
        # there so no uninitialized buffer is flushed.  Phase 1 writes block b.
        pl.BlockSpec((1, N, E), lambda p, b: (p * b, 0, 0)),
        pl.BlockSpec((H, N, N), lambda p, b: (0, 0, 0)),   # resident accumulator
    )
    out_shape = (jax.ShapeDtypeStruct((B, N, E), jnp.float32),
                 jax.ShapeDtypeStruct((H, N, N), jnp.float32))

    out, attn = pl.pallas_call(
        performer_attn_kernel,
        grid_spec=pltpu.PrefetchScalarGridSpec(
            num_scalar_prefetch=0,
            grid=(2, B),                       # (phase, row)
            in_specs=in_specs,
            out_specs=out_specs),
        out_shape=out_shape,
        compiler_params=pltpu.CompilerParams(
            # Both axes carry the attn reduction / phase ordering -> "arbitrary".
            # TODO(synk): at production sizes add a leading "parallel" query-block
            # axis (tiling N and the attn q-dim) for v7x megacore sharding.
            dimension_semantics=("arbitrary", "arbitrary"),
            # Ample for these tiles; size to the actual tile footprint at scale.
            vmem_limit_bytes=32 * 1024 * 1024),
    )(x_bf, wqt, bq, wkt, bk, wvt, bv, projbd, hmask)

    # TODO(synk): for the return_attn=False production path, skip materializing
    # the O(N^2) attn output entirely (the module's forward() does not build it).
    return out, attn


# ------------------------------------------------------------------
# Parameter init (deterministic, mirrors the shapes in __init__)
# ------------------------------------------------------------------
def gaussian_orthogonal_random_matrix(key, nb_rows, nb_columns, scaling=0):
    nb_full_blocks = nb_rows // nb_columns
    keys = jax.random.split(key, nb_full_blocks + 2)
    blocks = []
    for i in range(nb_full_blocks):
        unstructured = jax.random.normal(keys[i], (nb_columns, nb_columns), jnp.float32)
        q, _ = jnp.linalg.qr(unstructured)
        blocks.append(q.T)
    remaining = nb_rows - nb_full_blocks * nb_columns
    if remaining > 0:
        unstructured = jax.random.normal(keys[nb_full_blocks], (nb_columns, nb_columns),
                                         jnp.float32)
        q, _ = jnp.linalg.qr(unstructured)
        blocks.append(q.T[:remaining])
    final = jnp.concatenate(blocks, axis=0)
    if scaling == 0:
        multiplier = jnp.linalg.norm(
            jax.random.normal(keys[-1], (nb_rows, nb_columns), jnp.float32), axis=1)
    elif scaling == 1:
        multiplier = math.sqrt(float(nb_columns)) * jnp.ones((nb_rows,), jnp.float32)
    else:
        raise ValueError(f"Invalid scaling {scaling}")
    return multiplier[:, None] * final


def init_params(key, embed_dim, num_heads, ortho_scaling=0):
    head_dim = embed_dim // num_heads
    ks = jax.random.split(key, 7)
    bound = 1.0 / math.sqrt(embed_dim)   # nn.Linear default init
    u = lambda k, shape: jax.random.uniform(k, shape, jnp.float32, -bound, bound)
    return dict(
        wq=u(ks[0], (embed_dim, embed_dim)), bq=u(ks[1], (embed_dim,)),
        wk=u(ks[2], (embed_dim, embed_dim)), bk=u(ks[3], (embed_dim,)),
        wv=u(ks[4], (embed_dim, embed_dim)), bv=u(ks[5], (embed_dim,)),
        proj=gaussian_orthogonal_random_matrix(ks[6], embed_dim, head_dim, ortho_scaling),
    )


# ------------------------------------------------------------------
# Pure-JAX reference (faithful f32 transcription of Gene_Performer_attn.pred)
# ------------------------------------------------------------------
def reference_pred(x, params, num_heads):
    B, N, E = x.shape
    D = E // num_heads
    proj = params["proj"]
    M = proj.shape[0]

    def lin(w, b):
        return (x @ w.T + b).reshape(B, N, num_heads, D).transpose(0, 2, 1, 3)

    q = lin(params["wq"], params["bq"])
    k = lin(params["wk"], params["bk"])
    v = lin(params["wv"], params["bv"])

    def feat(data, is_query):
        dn = D ** (-0.25)
        ratio = M ** (-0.5)
        dd = jnp.einsum("bhnd,md->bhnm", dn * data, proj)
        diag = jnp.sum(data ** 2, axis=-1)[..., None] / 2.0 * dn ** 2
        if is_query:
            mx = jnp.max(dd, axis=-1, keepdims=True)
        else:
            mx = jnp.max(dd, axis=(-1, -2), keepdims=True)
        return ratio * (jnp.exp(dd - diag - mx) + EPS)

    qf, kf = feat(q, True), feat(k, False)
    qh = qf.transpose(1, 2, 0, 3).reshape(num_heads, N, B * M)
    kh = kf.transpose(1, 2, 0, 3).reshape(num_heads, N, B * M)
    vh = v.transpose(1, 2, 0, 3).reshape(num_heads, N, B * D)

    k_cumsum = kh.sum(axis=-2)
    d_inv = 1.0 / jnp.einsum("hnf,hf->hn", qh, k_cumsum)
    context = jnp.einsum("hnf,hne->hfe", kh, vh)
    out = jnp.einsum("hfe,hnf,hn->hne", context, qh, d_inv)
    out = out.reshape(num_heads, N, B, D).transpose(2, 1, 0, 3).reshape(B, N, E)
    attn = jnp.einsum("hqf,hkf->hqk", qh, kh)
    return out, attn


# ------------------------------------------------------------------
if __name__ == "__main__":
    embed_dim, num_heads = 32, 2
    num_rows, num_cols = 2, 8          # x: (num_rows, num_cols, embed_dim)

    key = jax.random.PRNGKey(0)
    kx, kparam = jax.random.split(key)
    x = jax.random.normal(kx, (num_rows, num_cols, embed_dim), jnp.float32)
    params = init_params(kparam, embed_dim, num_heads)

    out, attn = gene_performer_attn(x, params, num_heads)
    jax.block_until_ready((out, attn))

    assert out.shape == (num_rows, num_cols, embed_dim)
    assert attn.shape == (num_heads, num_cols, num_cols)

    out_want, attn_want = reference_pred(x, params, num_heads)
    # Tolerances account for bf16 MXU inputs (f32 accumulation) feeding exp().
    np.testing.assert_allclose(np.asarray(out), np.asarray(out_want), rtol=1e-1, atol=5e-2)
    np.testing.assert_allclose(np.asarray(attn), np.asarray(attn_want), rtol=1e-1, atol=5e-2)

    print("KERNEL_OK")
</pallas_src>

<mosaic_0001>
module attributes {stable_mosaic.version = 11 : i64} {
  func.func @performer_attn_kernel(%arg0: i32, %arg1: i32, %arg2: memref<1x8x32xbf16, #tpu.memory_space<vmem>>, %arg3: memref<32x32xbf16, #tpu.memory_space<vmem>>, %arg4: memref<1x32xf32, #tpu.memory_space<vmem>>, %arg5: memref<32x32xbf16, #tpu.memory_space<vmem>>, %arg6: memref<1x32xf32, #tpu.memory_space<vmem>>, %arg7: memref<32x32xbf16, #tpu.memory_space<vmem>>, %arg8: memref<1x32xf32, #tpu.memory_space<vmem>>, %arg9: memref<32x64xbf16, #tpu.memory_space<vmem>>, %arg10: memref<32x64xbf16, #tpu.memory_space<vmem>>, %arg11: memref<1x8x32xf32, #tpu.memory_space<vmem>>, %arg12: memref<2x8x8xf32, #tpu.memory_space<vmem>>) attributes {dimension_semantics = [#tpu.dimension_semantics<arbitrary>, #tpu.dimension_semantics<arbitrary>], iteration_bounds = array<i64: 2, 2>, scalar_prefetch = 0 : i64, scratch_operands = 0 : i64, tpu.core_type = #tpu.core_type<tc>, window_params = [{transform_indices = @transform_0, window_bounds = array<i64: 1, 8, 32>}, {pipeline_mode = #tpu.pipeline_mode<synchronous>, transform_indices = @transform_1, window_bounds = array<i64: 32, 32>}, {pipeline_mode = #tpu.pipeline_mode<synchronous>, transform_indices = @transform_2, window_bounds = array<i64: 1, 32>}, {pipeline_mode = #tpu.pipeline_mode<synchronous>, transform_indices = @transform_3, window_bounds = array<i64: 32, 32>}, {pipeline_mode = #tpu.pipeline_mode<synchronous>, transform_indices = @transform_4, window_bounds = array<i64: 1, 32>}, {pipeline_mode = #tpu.pipeline_mode<synchronous>, transform_indices = @transform_5, window_bounds = array<i64: 32, 32>}, {pipeline_mode = #tpu.pipeline_mode<synchronous>, transform_indices = @transform_6, window_bounds = array<i64: 1, 32>}, {pipeline_mode = #tpu.pipeline_mode<synchronous>, transform_indices = @transform_7, window_bounds = array<i64: 32, 64>}, {pipeline_mode = #tpu.pipeline_mode<synchronous>, transform_indices = @transform_8, window_bounds = array<i64: 32, 64>}, {transform_indices = @transform_9, window_bounds = array<i64: 1, 8, 32>}, {pipeline_mode = #tpu.pipeline_mode<synchronous>, transform_indices = @transform_10, window_bounds = array<i64: 2, 8, 8>}]} {
    %c0 = arith.constant 0 : index
    %c0_0 = arith.constant 0 : index
    %c0_1 = arith.constant 0 : index
    %0 = vector.load %arg2[%c0, %c0_0, %c0_1] : memref<1x8x32xbf16, #tpu.memory_space<vmem>>, vector<1x8x32xbf16>
    %1 = vector.shape_cast %0 : vector<1x8x32xbf16> to vector<8x32xbf16>
    %c0_i32 = arith.constant 0 : i32
    %2 = arith.cmpi eq, %arg0, %c0_i32 : i32
    %c0_i32_2 = arith.constant 0 : i32
    %3 = arith.cmpi eq, %arg1, %c0_i32_2 : i32
    %4 = arith.andi %2, %3 : i1
    %5 = arith.extui %4 : i1 to i32
    %c0_i32_3 = arith.constant 0 : i32
    %6 = arith.cmpi ne, %5, %c0_i32_3 : i32
    scf.if %6 {
      %cst = arith.constant 0.000000e+00 : f32
      %13 = vector.broadcast %cst : f32 to vector<2x8x8xf32>
      %c0_7 = arith.constant 0 : index
      %c0_8 = arith.constant 0 : index
      %c0_9 = arith.constant 0 : index
      %14 = vector.load %arg12[%c0_7, %c0_8, %c0_9] : memref<2x8x8xf32, #tpu.memory_space<vmem>>, vector<2x8x8xf32>
      tpu.vector_store %arg12[%c0_7, %c0_8, %c0_9], %13 {strides = array<i32>} : memref<2x8x8xf32, #tpu.memory_space<vmem>>, vector<2x8x8xf32>,
    } else {
    }
    %c0_i32_4 = arith.constant 0 : i32
    %7 = arith.cmpi eq, %arg0, %c0_i32_4 : i32
    %8 = arith.extui %7 : i1 to i32
    %c0_i32_5 = arith.constant 0 : i32
    %9 = arith.cmpi ne, %8, %c0_i32_5 : i32
    scf.if %9 {
      %c0_7 = arith.constant 0 : index
      %c0_8 = arith.constant 0 : index
      %13 = vector.load %arg3[%c0_7, %c0_8] : memref<32x32xbf16, #tpu.memory_space<vmem>>, vector<32x32xbf16>
      %cst = arith.constant dense<0.000000e+00> : vector<8x32xf32>
      %14 = tpu.matmul %1, %13, %cst {dimension_numbers = #tpu.dot_dimension_numbers<[1], [0], [0], [1], [0, 0, 1, 1], [], []>} : vector<8x32xbf16>, vector<32x32xbf16>, vector<8x32xf32> -> vector<8x32xf32>
      %c0_9 = arith.constant 0 : index
      %c0_10 = arith.constant 0 : index
      %15 = vector.load %arg4[%c0_9, %c0_10] : memref<1x32xf32, #tpu.memory_space<vmem>>, vector<1x32xf32>
      %16 = vector.broadcast %15 : vector<1x32xf32> to vector<8x32xf32>
      %17 = arith.addf %14, %16 : vector<8x32xf32>
      %c0_11 = arith.constant 0 : index
      %c0_12 = arith.constant 0 : index
      %18 = vector.load %arg5[%c0_11, %c0_12] : memref<32x32xbf16, #tpu.memory_space<vmem>>, vector<32x32xbf16>
      %cst_13 = arith.constant dense<0.000000e+00> : vector<8x32xf32>
      %19 = tpu.matmul %1, %18, %cst_13 {dimension_numbers = #tpu.dot_dimension_numbers<[1], [0], [0], [1], [0, 0, 1, 1], [], []>} : vector<8x32xbf16>, vector<32x32xbf16>, vector<8x32xf32> -> vector<8x32xf32>
      %c0_14 = arith.constant 0 : index
      %c0_15 = arith.constant 0 : index
      %20 = vector.load %arg6[%c0_14, %c0_15] : memref<1x32xf32, #tpu.memory_space<vmem>>, vector<1x32xf32>
      %21 = vector.broadcast %20 : vector<1x32xf32> to vector<8x32xf32>
      %22 = arith.addf %19, %21 : vector<8x32xf32>
      %23 = arith.truncf %17 : vector<8x32xf32> to vector<8x32xbf16>
      %c0_16 = arith.constant 0 : index
      %c0_17 = arith.constant 0 : index
      %24 = vector.load %arg9[%c0_16, %c0_17] : memref<32x64xbf16, #tpu.memory_space<vmem>>, vector<32x64xbf16>
      %cst_18 = arith.constant dense<0.000000e+00> : vector<8x64xf32>
      %25 = tpu.matmul %23, %24, %cst_18 {dimension_numbers = #tpu.dot_dimension_numbers<[1], [0], [0], [1], [0, 0, 1, 1], [], []>} : vector<8x32xbf16>, vector<32x64xbf16>, vector<8x64xf32> -> vector<8x64xf32>
      %26 = arith.truncf %22 : vector<8x32xf32> to vector<8x32xbf16>
      %c0_19 = arith.constant 0 : index
      %c0_20 = arith.constant 0 : index
      %27 = vector.load %arg9[%c0_19, %c0_20] : memref<32x64xbf16, #tpu.memory_space<vmem>>, vector<32x64xbf16>
      %cst_21 = arith.constant dense<0.000000e+00> : vector<8x64xf32>
      %28 = tpu.matmul %26, %27, %cst_21 {dimension_numbers = #tpu.dot_dimension_numbers<[1], [0], [0], [1], [0, 0, 1, 1], [], []>} : vector<8x32xbf16>, vector<32x64xbf16>, vector<8x64xf32> -> vector<8x64xf32>
      %29 = arith.mulf %17, %17 : vector<8x32xf32>
      %30 = arith.truncf %29 : vector<8x32xf32> to vector<8x32xbf16>
      %c0_22 = arith.constant 0 : index
      %c0_23 = arith.constant 0 : index
      %31 = vector.load %arg10[%c0_22, %c0_23] : memref<32x64xbf16, #tpu.memory_space<vmem>>, vector<32x64xbf16>
      %cst_24 = arith.constant dense<0.000000e+00> : vector<8x64xf32>
      %32 = tpu.matmul %30, %31, %cst_24 {dimension_numbers = #tpu.dot_dimension_numbers<[1], [0], [0], [1], [0, 0, 1, 1], [], []>} : vector<8x32xbf16>, vector<32x64xbf16>, vector<8x64xf32> -> vector<8x64xf32>
      %cst_25 = arith.constant 1.250000e-01 : f32
      %33 = vector.broadcast %cst_25 : f32 to vector<8x64xf32>
      %34 = arith.mulf %32, %33 : vector<8x64xf32>
      %35 = arith.mulf %22, %22 : vector<8x32xf32>
      %36 = arith.truncf %35 : vector<8x32xf32> to vector<8x32xbf16>
      %c0_26 = arith.constant 0 : index
      %c0_27 = arith.constant 0 : index
      %37 = vector.load %arg10[%c0_26, %c0_27] : memref<32x64xbf16, #tpu.memory_space<vmem>>, vector<32x64xbf16>
      %cst_28 = arith.constant dense<0.000000e+00> : vector<8x64xf32>
      %38 = tpu.matmul %36, %37, %cst_28 {dimension_numbers = #tpu.dot_dimension_numbers<[1], [0], [0], [1], [0, 0, 1, 1], [], []>} : vector<8x32xbf16>, vector<32x64xbf16>, vector<8x64xf32> -> vector<8x64xf32>
      %cst_29 = arith.constant 1.250000e-01 : f32
      %39 = vector.broadcast %cst_29 : f32 to vector<8x64xf32>
      %40 = arith.mulf %38, %39 : vector<8x64xf32>
      %41 = vector.extract_strided_slice %25 {offsets = [0, 0], sizes = [8, 32], strides = [1, 1]} : vector<8x64xf32> to vector<8x32xf32>
      %42 = vector.extract_strided_slice %28 {offsets = [0, 0], sizes = [8, 32], strides = [1, 1]} : vector<8x64xf32> to vector<8x32xf32>
      %cst_30 = arith.constant dense<0xFF800000> : vector<8xf32>
      %43 = vector.multi_reduction <maximumf>, %41, %cst_30 [1] : vector<8x32xf32> to vector<8xf32>
      %44 = vector.shape_cast %43 : vector<8xf32> to vector<8x1xf32>
      %45 = vector.shape_cast %42 : vector<8x32xf32> to vector<1x8x32xf32>
      %cst_31 = arith.constant dense<0xFF800000> : vector<1xf32>
      %46 = vector.multi_reduction <maximumf>, %45, %cst_31 [1, 2] : vector<1x8x32xf32> to vector<1xf32>
      %47 = vector.shape_cast %46 : vector<1xf32> to vector<1x1x1xf32>
      %48 = vector.extract %47[0, 0, 0] : f32 from vector<1x1x1xf32>
      %49 = vector.broadcast %48 : f32 to vector<1x1xf32>
      %50 = vector.extract_strided_slice %34 {offsets = [0, 0], sizes = [8, 32], strides = [1, 1]} : vector<8x64xf32> to vector<8x32xf32>
      %51 = arith.subf %41, %50 : vector<8x32xf32>
      %52 = vector.broadcast %44 : vector<8x1xf32> to vector<8x32xf32>
      %53 = arith.subf %51, %52 : vector<8x32xf32>
      %54 = math.exp %53 : vector<8x32xf32>
      %cst_32 = arith.constant 9.99999974E-5 : f32
      %55 = vector.broadcast %cst_32 : f32 to vector<8x32xf32>
      %56 = arith.addf %54, %55 : vector<8x32xf32>
      %cst_33 = arith.constant 0.176776692 : f32
      %57 = vector.broadcast %cst_33 : f32 to vector<8x32xf32>
      %58 = arith.mulf %57, %56 : vector<8x32xf32>
      %59 = vector.extract_strided_slice %40 {offsets = [0, 0], sizes = [8, 32], strides = [1, 1]} : vector<8x64xf32> to vector<8x32xf32>
      %60 = arith.subf %42, %59 : vector<8x32xf32>
      %61 = vector.broadcast %49 : vector<1x1xf32> to vector<8x32xf32>
      %62 = arith.subf %60, %61 : vector<8x32xf32>
      %63 = math.exp %62 : vector<8x32xf32>
      %cst_34 = arith.constant 9.99999974E-5 : f32
      %64 = vector.broadcast %cst_34 : f32 to vector<8x32xf32>
      %65 = arith.addf %63, %64 : vector<8x32xf32>
      %cst_35 = arith.constant 0.176776692 : f32
      %66 = vector.broadcast %cst_35 : f32 to vector<8x32xf32>
      %67 = arith.mulf %66, %65 : vector<8x32xf32>
      %c0_36 = arith.constant 0 : index
      %c0_37 = arith.constant 0 : index
      %c0_38 = arith.constant 0 : index
      %68 = vector.load %arg12[%c0_36, %c0_37, %c0_38] : memref<2x8x8xf32, #tpu.memory_space<vmem>>, vector<1x8x8xf32>
      %69 = vector.shape_cast %68 : vector<1x8x8xf32> to vector<8x8xf32>
      %70 = arith.truncf %58 : vector<8x32xf32> to vector<8x32xbf16>
      %71 = arith.truncf %67 : vector<8x32xf32> to vector<8x32xbf16>
      %cst_39 = arith.constant dense<0.000000e+00> : vector<8x8xf32>
      %72 = tpu.matmul %70, %71, %cst_39 {dimension_numbers = #tpu.dot_dimension_numbers<[1], [1], [0], [0], [0, 0, 1, 0], [], []>} : vector<8x32xbf16>, vector<8x32xbf16>, vector<8x8xf32> -> vector<8x8xf32>
      %73 = arith.addf %69, %72 : vector<8x8xf32>
      %c0_40 = arith.constant 0 : index
      %c0_41 = arith.constant 0 : index
      %c0_42 = arith.constant 0 : index
      %74 = vector.load %arg12[%c0_40, %c0_41, %c0_42] : memref<2x8x8xf32, #tpu.memory_space<vmem>>, vector<1x8x8xf32>
      %75 = vector.shape_cast %74 : vector<1x8x8xf32> to vector<8x8xf32>
      %76 = vector.shape_cast %73 : vector<8x8xf32> to vector<1x8x8xf32>
      tpu.vector_store %arg12[%c0_40, %c0_41, %c0_42], %76 {strides = array<i32>} : memref<2x8x8xf32, #tpu.memory_space<vmem>>, vector<1x8x8xf32>,
      %77 = vector.extract_strided_slice %25 {offsets = [0, 32], sizes = [8, 32], strides = [1, 1]} : vector<8x64xf32> to vector<8x32xf32>
      %78 = vector.extract_strided_slice %28 {offsets = [0, 32], sizes = [8, 32], strides = [1, 1]} : vector<8x64xf32> to vector<8x32xf32>
      %cst_43 = arith.constant dense<0xFF800000> : vector<8xf32>
      %79 = vector.multi_reduction <maximumf>, %77, %cst_43 [1] : vector<8x32xf32> to vector<8xf32>
      %80 = vector.shape_cast %79 : vector<8xf32> to vector<8x1xf32>
      %81 = vector.shape_cast %78 : vector<8x32xf32> to vector<1x8x32xf32>
      %cst_44 = arith.constant dense<0xFF800000> : vector<1xf32>
      %82 = vector.multi_reduction <maximumf>, %81, %cst_44 [1, 2] : vector<1x8x32xf32> to vector<1xf32>
      %83 = vector.shape_cast %82 : vector<1xf32> to vector<1x1x1xf32>
      %84 = vector.extract %83[0, 0, 0] : f32 from vector<1x1x1xf32>
      %85 = vector.broadcast %84 : f32 to vector<1x1xf32>
      %86 = vector.extract_strided_slice %34 {offsets = [0, 32], sizes = [8, 32], strides = [1, 1]} : vector<8x64xf32> to vector<8x32xf32>
      %87 = arith.subf %77, %86 : vector<8x32xf32>
      %88 = vector.broadcast %80 : vector<8x1xf32> to vector<8x32xf32>
      %89 = arith.subf %87, %88 : vector<8x32xf32>
      %90 = math.exp %89 : vector<8x32xf32>
      %cst_45 = arith.constant 9.99999974E-5 : f32
      %91 = vector.broadcast %cst_45 : f32 to vector<8x32xf32>
      %92 = arith.addf %90, %91 : vector<8x32xf32>
      %cst_46 = arith.constant 0.176776692 : f32
      %93 = vector.broadcast %cst_46 : f32 to vector<8x32xf32>
      %94 = arith.mulf %93, %92 : vector<8x32xf32>
      %95 = vector.extract_strided_slice %40 {offsets = [0, 32], sizes = [8, 32], strides = [1, 1]} : vector<8x64xf32> to vector<8x32xf32>
      %96 = arith.subf %78, %95 : vector<8x32xf32>
      %97 = vector.broadcast %85 : vector<1x1xf32> to vector<8x32xf32>
      %98 = arith.subf %96, %97 : vector<8x32xf32>
      %99 = math.exp %98 : vector<8x32xf32>
      %cst_47 = arith.constant 9.99999974E-5 : f32
      %100 = vector.broadcast %cst_47 : f32 to vector<8x32xf32>
      %101 = arith.addf %99, %100 : vector<8x32xf32>
      %cst_48 = arith.constant 0.176776692 : f32
      %102 = vector.broadcast %cst_48 : f32 to vector<8x32xf32>
      %103 = arith.mulf %102, %101 : vector<8x32xf32>
      %c1 = arith.constant 1 : index
      %c0_49 = arith.constant 0 : index
      %c0_50 = arith.constant 0 : index
      %104 = vector.load %arg12[%c1, %c0_49, %c0_50] : memref<2x8x8xf32, #tpu.memory_space<vmem>>, vector<1x8x8xf32>
      %105 = vector.shape_cast %104 : vector<1x8x8xf32> to vector<8x8xf32>
      %106 = arith.truncf %94 : vector<8x32xf32> to vector<8x32xbf16>
      %107 = arith.truncf %103 : vector<8x32xf32> to vector<8x32xbf16>
      %cst_51 = arith.constant dense<0.000000e+00> : vector<8x8xf32>
      %108 = tpu.matmul %106, %107, %cst_51 {dimension_numbers = #tpu.dot_dimension_numbers<[1], [1], [0], [0], [0, 0, 1, 0], [], []>} : vector<8x32xbf16>, vector<8x32xbf16>, vector<8x8xf32> -> vector<8x8xf32>
      %109 = arith.addf %105, %108 : vector<8x8xf32>
      %c1_52 = arith.constant 1 : index
      %c0_53 = arith.constant 0 : index
      %c0_54 = arith.constant 0 : index
      %110 = vector.load %arg12[%c1_52, %c0_53, %c0_54] : memref<2x8x8xf32, #tpu.memory_space<vmem>>, vector<1x8x8xf32>
      %111 = vector.shape_cast %110 : vector<1x8x8xf32> to vector<8x8xf32>
      %112 = vector.shape_cast %109 : vector<8x8xf32> to vector<1x8x8xf32>
      tpu.vector_store %arg12[%c1_52, %c0_53, %c0_54], %112 {strides = array<i32>} : memref<2x8x8xf32, #tpu.memory_space<vmem>>, vector<1x8x8xf32>,
    } else {
    }
    %c1_i32 = arith.constant 1 : i32
    %10 = arith.cmpi eq, %arg0, %c1_i32 : i32
    %11 = arith.extui %10 : i1 to i32
    %c0_i32_6 = arith.constant 0 : i32
    %12 = arith.cmpi ne, %11, %c0_i32_6 : i32
    scf.if %12 {
      %c0_7 = arith.constant 0 : index
      %c0_8 = arith.constant 0 : index
      %13 = vector.load %arg7[%c0_7, %c0_8] : memref<32x32xbf16, #tpu.memory_space<vmem>>, vector<32x32xbf16>
      %cst = arith.constant dense<0.000000e+00> : vector<8x32xf32>
      %14 = tpu.matmul %1, %13, %cst {dimension_numbers = #tpu.dot_dimension_numbers<[1], [0], [0], [1], [0, 0, 1, 1], [], []>} : vector<8x32xbf16>, vector<32x32xbf16>, vector<8x32xf32> -> vector<8x32xf32>
      %c0_9 = arith.constant 0 : index
      %c0_10 = arith.constant 0 : index
      %15 = vector.load %arg8[%c0_9, %c0_10] : memref<1x32xf32, #tpu.memory_space<vmem>>, vector<1x32xf32>
      %16 = vector.broadcast %15 : vector<1x32xf32> to vector<8x32xf32>
      %17 = arith.addf %14, %16 : vector<8x32xf32>
      %c0_11 = arith.constant 0 : index
      %c0_12 = arith.constant 0 : index
      %c0_13 = arith.constant 0 : index
      %18 = vector.load %arg12[%c0_11, %c0_12, %c0_13] : memref<2x8x8xf32, #tpu.memory_space<vmem>>, vector<1x8x8xf32>
      %19 = vector.shape_cast %18 : vector<1x8x8xf32> to vector<8x8xf32>
      %cst_14 = arith.constant dense<0.000000e+00> : vector<8xf32>
      %20 = vector.multi_reduction <add>, %19, %cst_14 [1] : vector<8x8xf32> to vector<8xf32>
      %21 = vector.shape_cast %20 : vector<8xf32> to vector<8x1xf32>
      %22 = tpu.reciprocal %21 {approx = true} : vector<8x1xf32> -> vector<8x1xf32>
      %23 = vector.broadcast %22 : vector<8x1xf32> to vector<8x8xf32>
      %24 = arith.mulf %19, %23 : vector<8x8xf32>
      %25 = arith.truncf %24 : vector<8x8xf32> to vector<8x8xbf16>
      %26 = vector.extract_strided_slice %17 {offsets = [0, 0], sizes = [8, 16], strides = [1, 1]} : vector<8x32xf32> to vector<8x16xf32>
      %27 = arith.truncf %26 : vector<8x16xf32> to vector<8x16xbf16>
      %cst_15 = arith.constant dense<0.000000e+00> : vector<8x16xf32>
      %28 = tpu.matmul %25, %27, %cst_15 {dimension_numbers = #tpu.dot_dimension_numbers<[1], [0], [0], [1], [0, 0, 1, 1], [], []>} : vector<8x8xbf16>, vector<8x16xbf16>, vector<8x16xf32> -> vector<8x16xf32>
      %c1 = arith.constant 1 : index
      %c0_16 = arith.constant 0 : index
      %c0_17 = arith.constant 0 : index
      %29 = vector.load %arg12[%c1, %c0_16, %c0_17] : memref<2x8x8xf32, #tpu.memory_space<vmem>>, vector<1x8x8xf32>
      %30 = vector.shape_cast %29 : vector<1x8x8xf32> to vector<8x8xf32>
      %cst_18 = arith.constant dense<0.000000e+00> : vector<8xf32>
      %31 = vector.multi_reduction <add>, %30, %cst_18 [1] : vector<8x8xf32> to vector<8xf32>
      %32 = vector.shape_cast %31 : vector<8xf32> to vector<8x1xf32>
      %33 = tpu.reciprocal %32 {approx = true} : vector<8x1xf32> -> vector<8x1xf32>
      %34 = vector.broadcast %33 : vector<8x1xf32> to vector<8x8xf32>
      %35 = arith.mulf %30, %34 : vector<8x8xf32>
      %36 = arith.truncf %35 : vector<8x8xf32> to vector<8x8xbf16>
      %37 = vector.extract_strided_slice %17 {offsets = [0, 16], sizes = [8, 16], strides = [1, 1]} : vector<8x32xf32> to vector<8x16xf32>
      %38 = arith.truncf %37 : vector<8x16xf32> to vector<8x16xbf16>
      %cst_19 = arith.constant dense<0.000000e+00> : vector<8x16xf32>
      %39 = tpu.matmul %36, %38, %cst_19 {dimension_numbers = #tpu.dot_dimension_numbers<[1], [0], [0], [1], [0, 0, 1, 1], [], []>} : vector<8x8xbf16>, vector<8x16xbf16>, vector<8x16xf32> -> vector<8x16xf32>
      %40 = tpu.concatenate %28, %39 in 1 : vector<8x16xf32>, vector<8x16xf32> -> vector<8x32xf32>
      %c0_20 = arith.constant 0 : index
      %c0_21 = arith.constant 0 : index
      %c0_22 = arith.constant 0 : index
      %41 = vector.load %arg11[%c0_20, %c0_21, %c0_22] : memref<1x8x32xf32, #tpu.memory_space<vmem>>, vector<1x8x32xf32>
      %42 = vector.shape_cast %41 : vector<1x8x32xf32> to vector<8x32xf32>
      %43 = vector.shape_cast %40 : vector<8x32xf32> to vector<1x8x32xf32>
      tpu.vector_store %arg11[%c0_20, %c0_21, %c0_22], %43 {strides = array<i32>} : memref<1x8x32xf32, #tpu.memory_space<vmem>>, vector<1x8x32xf32>,
    } else {
    }
    return
  }
  func.func @transform_0(%arg0: i32, %arg1: i32) -> (i32, i32, i32) {
    %c0_i32 = arith.constant 0 : i32
    %c0_i32_0 = arith.constant 0 : i32
    %c0_i32_1 = arith.constant 0 : i32
    return %arg1, %c0_i32, %c0_i32_0 : i32, i32, i32
  }
  func.func @transform_1(%arg0: i32, %arg1: i32) -> (i32, i32) {
    %c0_i32 = arith.constant 0 : i32
    %c0_i32_0 = arith.constant 0 : i32
    %c0_i32_1 = arith.constant 0 : i32
    return %c0_i32, %c0_i32_0 : i32, i32
  }
  func.func @transform_2(%arg0: i32, %arg1: i32) -> (i32, i32) {
    %c0_i32 = arith.constant 0 : i32
    %c0_i32_0 = arith.constant 0 : i32
    %c0_i32_1 = arith.constant 0 : i32
    return %c0_i32, %c0_i32_0 : i32, i32
  }
  func.func @transform_3(%arg0: i32, %arg1: i32) -> (i32, i32) {
    %c0_i32 = arith.constant 0 : i32
    %c0_i32_0 = arith.constant 0 : i32
    %c0_i32_1 = arith.constant 0 : i32
    return %c0_i32, %c0_i32_0 : i32, i32
  }
  func.func @transform_4(%arg0: i32, %arg1: i32) -> (i32, i32) {
    %c0_i32 = arith.constant 0 : i32
    %c0_i32_0 = arith.constant 0 : i32
    %c0_i32_1 = arith.constant 0 : i32
    return %c0_i32, %c0_i32_0 : i32, i32
  }
  func.func @transform_5(%arg0: i32, %arg1: i32) -> (i32, i32) {
    %c0_i32 = arith.constant 0 : i32
    %c0_i32_0 = arith.constant 0 : i32
    %c0_i32_1 = arith.constant 0 : i32
    return %c0_i32, %c0_i32_0 : i32, i32
  }
  func.func @transform_6(%arg0: i32, %arg1: i32) -> (i32, i32) {
    %c0_i32 = arith.constant 0 : i32
    %c0_i32_0 = arith.constant 0 : i32
    %c0_i32_1 = arith.constant 0 : i32
    return %c0_i32, %c0_i32_0 : i32, i32
  }
  func.func @transform_7(%arg0: i32, %arg1: i32) -> (i32, i32) {
    %c0_i32 = arith.constant 0 : i32
    %c0_i32_0 = arith.constant 0 : i32
    %c0_i32_1 = arith.constant 0 : i32
    return %c0_i32, %c0_i32_0 : i32, i32
  }
  func.func @transform_8(%arg0: i32, %arg1: i32) -> (i32, i32) {
    %c0_i32 = arith.constant 0 : i32
    %c0_i32_0 = arith.constant 0 : i32
    %c0_i32_1 = arith.constant 0 : i32
    return %c0_i32, %c0_i32_0 : i32, i32
  }
  func.func @transform_9(%arg0: i32, %arg1: i32) -> (i32, i32, i32) {
    %0 = arith.muli %arg0, %arg1 : i32
    %c0_i32 = arith.constant 0 : i32
    %c0_i32_0 = arith.constant 0 : i32
    %c0_i32_1 = arith.constant 0 : i32
    return %0, %c0_i32, %c0_i32_0 : i32, i32, i32
  }
  func.func @transform_10(%arg0: i32, %arg1: i32) -> (i32, i32, i32) {
    %c0_i32 = arith.constant 0 : i32
    %c0_i32_0 = arith.constant 0 : i32
    %c0_i32_1 = arith.constant 0 : i32
    %c0_i32_2 = arith.constant 0 : i32
    return %c0_i32, %c0_i32_0, %c0_i32_1 : i32, i32, i32
  }
}

</mosaic_0001>

<bundles_post_ra>
// kernel: tpu_custom_call.1
= control target key start
LH: loop header
LB: loop body
LE: loop exit
PB: predicated region body
PF: predicated region fallthrough
CT: control target
= control target key end

     0   :  { %s2473_s0 = inlined_call_operand.hbm [shape: bf16[2,8,32], index: 0, kind: input, shape index: {}]   ;;  %s2474_s1 = inlined_call_operand.hbm [shape: bf16[32,32], index: 1, kind: input, shape index: {}]   ;;  %s2475_s2 = inlined_call_operand.vmem [shape: f32[1,32], index: 2, kind: input, shape index: {}]   ;;  %s2476_s3 = inlined_call_operand.hbm [shape: bf16[32,32], index: 3, kind: input, shape index: {}]   ;;  %s2477_s4 = inlined_call_operand.vmem [shape: f32[1,32], index: 4, kind: input, shape index: {}]   ;;  %s2478_s5 = inlined_call_operand.hbm [shape: bf16[32,32], index: 5, kind: input, shape index: {}]   ;;  %s2479_s6 = inlined_call_operand.vmem [shape: f32[1,32], index: 6, kind: input, shape index: {}]   ;;  %s2480_s7 = inlined_call_operand.hbm [shape: bf16[32,64], index: 7, kind: input, shape index: {}]   ;;  %s2481_s8 = inlined_call_operand.hbm [shape: bf16[32,64], index: 8, kind: input, shape index: {}]   ;;  %s2482_s9 = inlined_call_operand.hbm [shape: f32[2,8,32], index: 9, kind: output, shape index: {0}]   ;;  %s2483_s10 = inlined_call_operand.hbm [shape: f32[2,8,8], index: 10, kind: output, shape index: {1}]  }
   0x1   :  { %2490 = sst [smem:[#allocation26_spill]] %s2474_s1 }
   0x2   :  { %2491 = sst [smem:[#allocation27_spill]] %s2475_s2 }
   0x3   :  { %2492 = sst [smem:[#allocation28_spill]] %s2476_s3 }
   0x4   :  { %2493 = sst [smem:[#allocation29_spill]] %s2477_s4 }
   0x5   :  { %2494 = sst [smem:[#allocation30_spill]] %s2478_s5 }
   0x6   :  { %2495 = sst [smem:[#allocation31_spill]] %s2479_s6 }
   0x7   :  { %2496 = sst [smem:[#allocation32_spill]] %s2480_s7 }
   0x8   :  { %2497 = sst [smem:[#allocation33_spill]] %s2481_s8 }
   0x9   :  { %2498 = sst [smem:[#allocation34_spill]] %s2482_s9 }
   0xa   :  { %2499 = sst [smem:[#allocation35_spill]] %s2483_s10 }
   0xb   :  { %16 = vsyncpa [#allocation3], 0 }
   0xc   :  { %18 = vsyncpa [#allocation3 + $0x1], 0 }
   0xd   :  { %19 = vsyncpa [#allocation6], 0 }
   0xe   :  { %20 = vsyncpa [#allocation9], 0 }
   0xf   :  { %21 = vsyncpa [#allocation12], 0 }
  0x10   :  { %22 = vsyncpa [#allocation4], 0 }
  0x11   :  { %24 = vsyncpa [#allocation4 + $0x1], 0 }
  0x12   :  { %25 = vsyncpa [#allocation15], 0  ;;  %s2091_s13 = smov 0   ;;  %s2093_s14 = smov 0  }
  0x13   :  { %s2095_s15 = smov 0   ;;  %s2097_s16 = smov 0  }
  0x14   :  { %s2099_s17 = smov 0   ;;  %s2101_s18 = smov 0  }
  0x15   :  { %s2103_s19 = smov 0   ;;  %s2105_s20 = smov 0  }
  0x16   :  { %s2107_s21 = smov 0   ;;  %s2109_s22 = smov 0  }
  0x17   :  { %s2111_s23 = smov 0  }
  0x18 LB: > { %2500 = sst [smem:[#allocation22_spill]] %s2006_s21  ;;  %s1338_s24 = sadd.s32 4294967295, %s2014_s23   ;;  %s2014_s23 = sphi %s2111_s23, %s31_s23   ;;  %s2010_s22 = sphi %s2109_s22, %s2529_s22   ;;  %s2006_s21 = sphi %s2107_s21, %s2528_s21   ;;  %s2002_s20 = sphi %s2105_s20, %s2527_s20   ;;  %s1998_s19 = sphi %s2103_s19, %s2526_s19   ;;  %s1994_s18 = sphi %s2101_s18, %s2535_s18   ;;  %s1990_s17 = sphi %s2099_s17, %s2534_s17   ;;  %s1986_s16 = sphi %s2097_s16, %s2533_s16   ;;  %s1982_s15 = sphi %s2095_s15, %s2532_s15   ;;  %s1978_s14 = sphi %s2093_s14, %s2531_s14   ;;  %s1974_s13 = sphi %s2091_s13, %s2530_s13  }
  0x19   : > { %2501 = sst [smem:[#allocation23_spill]] %s2010_s22  ;;  %p1340_p0 = scmp.ge.s32.totalorder %s2014_s23, 1 }
  0x1a   : > { %p2148_p1 = scmp.eq.s32.totalorder %s1338_s24, 0  ;;  %p2152_p2 = scmp.eq.s32.totalorder %s1338_s24, 3 }
  0x1b   : > { %p291_p3 = scmp.lt.s32.totalorder %s2014_s23, 5  ;;  %s2016_s28 = smov [#allocation5]  }
  0x1c   : > { %s303_s29 = sshll.u32 %s2016_s28, 4  ;;  %s2017_s11 = smov [#allocation8]   ;;  %s304_s29 = int_to_ptr.vmem [resolvable:$true] %s303_s29 }
  0x1d   : > { %p2157_p4 = pnand %p1340_p0, %p291_p3  ;;  %s335_s12 = sshll.u32 %s2017_s11, 4  ;;  %s2169_s12 = int_to_ptr.vmem [resolvable:$true] %s335_s12 }
  0x1e   : > { %s2018_s24 = smov [#allocation7]   ;;  %s1707_s9 = scalar_lea.vmem %s304_s29, 256 }
  0x1f   : > { %s2504_s27 = scalar_select %p2157_p4, 1, 0 }
  0x20   : > { %p1530_p5 = pneg %p2157_p4  ;;  %s319_s10 = sshll.u32 %s2018_s24, 4  ;;  %s2171_s10 = int_to_ptr.vmem [resolvable:$true] %s319_s10 }
  0x21   : > { %p1708_p8 = scmp.ne.s32.totalorder %s304_s29, %s1707_s9  ;;  %p1715_p11 = scmp.lt.s32.totalorder %s304_s29, %s304_s29 }
  0x22   : > { %p2165_p6 = pnand %p1530_p5, %p2148_p1  ;;  %p1716_p12 = scmp.lt.s32.totalorder %s1707_s9, %s1707_s9 }
  0x24   : > { %p2175_p7 = pneg %p2165_p6  ;;  %p1717_p13 = por %p1716_p12, %p1715_p11 }
  0x26   : > { %p1710_p9 = pnand %p1708_p8, %p2175_p7 }
  0x28   : > { %p1711_p10 = pneg %p1710_p9 }
  0x2a   : > { %p1718_p0 = pnand %p1717_p13, %p1711_p10 }
  0x2c   : > { %1721 = shalt.err (!%p1718_p0)
}
  0x2d   : > { %s2019_s11 = smov 64   ;;  %s2020_s24 = smov 4  }
  0x2e   : > { %s2507_s1 = sld [smem:[#allocation26_spill]]  ;;  %s1733_s2 = scalar_lea.vmem %s2169_s12, 256 }
  0x2f   : > { %p1734_p3 = scmp.ne.s32.totalorder %s2169_s12, %s1733_s2  ;;  %p1741_p9 = scmp.lt.s32.totalorder %s2169_s12, %s2169_s12 }
  0x30   : > { %p1742_p10 = scmp.lt.s32.totalorder %s1733_s2, %s1733_s2 }
  0x31   : > { %p1736_p5 = pnand %p1734_p3, %p2175_p7 }
  0x32   : > { %p1743_p11 = por %p1742_p10, %p1741_p9 }
  0x33   : > { %p1737_p8 = pneg %p1736_p5 }
  0x34   : > { %1533 = dma.hbm_to_vmem [thread:$0]  (!%p2165_p6), %s2507_s1, 256, %s304_s29, [#allocation6], %s2019_s11, %s2019_s11, %s2020_s24  }
  0x35   : > { %p1744_p12 = pnand %p1743_p11, %p1737_p8 }
  0x37   : > { %1747 = shalt.err (!%p1744_p12)
}
  0x38   : > { %s2508_s5 = sld [smem:[#allocation30_spill]]  ;;  %s1759_s6 = scalar_lea.vmem %s2171_s10, 256 }
  0x39   : > { %p1760_p13 = scmp.ne.s32.totalorder %s2171_s10, %s1759_s6  ;;  %p1767_p5 = scmp.lt.s32.totalorder %s2171_s10, %s2171_s10 }
  0x3a   : > { %p1768_p8 = scmp.lt.s32.totalorder %s1759_s6, %s1759_s6 }
  0x3b   : > { %p1762_p0 = pnand %p1760_p13, %p2175_p7 }
  0x3c   : > { %p1769_p9 = por %p1768_p8, %p1767_p5 }
  0x3d   : > { %p1763_p3 = pneg %p1762_p0 }
  0x3e   : > { %1539 = dma.hbm_to_vmem [thread:$0]  (!%p2165_p6), %s2508_s5, 256, %s2169_s12, [#allocation9], %s2019_s11, %s2019_s11, %s2020_s24  }
  0x3f   : > { %p1770_p10 = pnand %p1769_p9, %p1763_p3 }
  0x41   : > { %1773 = shalt.err (!%p1770_p10)
}
  0x42   : > { %s2509_s3 = sld [smem:[#allocation28_spill]]  ;;  %s2021_s12 = smov [#allocation10]  }
  0x43   : > { %s351_s9 = sshll.u32 %s2021_s12, 4  ;;  %s2022_s4 = smov [#allocation11]   ;;  %s352_s9 = int_to_ptr.vmem [resolvable:$true] %s351_s9 }
  0x44   : > { %s364_s1 = sshll.u32 %s2022_s4, 4  ;;  %s1785_s6 = scalar_lea.vmem %s352_s9, 256  ;;  %s365_s1 = int_to_ptr.vmem [resolvable:$true] %s364_s1 }
  0x45   : > { %p1786_p11 = scmp.ne.s32.totalorder %s352_s9, %s1785_s6  ;;  %p1793_p0 = scmp.lt.s32.totalorder %s352_s9, %s352_s9 }
  0x46   : > { %p1794_p3 = scmp.lt.s32.totalorder %s1785_s6, %s1785_s6 }
  0x47   : > { %p1788_p12 = pnand %p1786_p11, %p2175_p7 }
  0x48   : > { %1536 = dma.hbm_to_vmem [thread:$0]  (!%p2165_p6), %s2509_s3, 256, %s2171_s10, [#allocation6], %s2019_s11, %s2019_s11, %s2020_s24  }
  0x49   : > { %p1789_p13 = pneg %p1788_p12  ;;  %p1795_p5 = por %p1794_p3, %p1793_p0 }
  0x4b   : > { %p1796_p8 = pnand %p1795_p5, %p1789_p13 }
  0x4d   : > { %1799 = shalt.err (!%p1796_p8)
}
  0x4e   : > { %s2510_s7 = sld [smem:[#allocation32_spill]]  ;;  %s1811_s29 = scalar_lea.vmem %s365_s1, 256 }
  0x4f   : > { %p1812_p9 = scmp.ne.s32.totalorder %s365_s1, %s1811_s29  ;;  %p1819_p12 = scmp.lt.s32.totalorder %s365_s1, %s365_s1 }
  0x50   : > { %p1820_p4 = scmp.lt.s32.totalorder %s1811_s29, %s1811_s29 }
  0x51   : > { %p1814_p10 = pnand %p1812_p9, %p2175_p7 }
  0x52   : > { %p1821_p0 = por %p1820_p4, %p1819_p12 }
  0x53   : > { %p1815_p11 = pneg %p1814_p10 }
  0x54   : > { %1542 = dma.hbm_to_vmem [thread:$0]  (!%p2165_p6), %s2510_s7, 256, %s352_s9, [#allocation9], %s2019_s11, %s2019_s11, %s2020_s24  }
  0x55   : > { %p1822_p13 = pnand %p1821_p0, %p1815_p11 }
  0x57   : > { %1825 = shalt.err (!%p1822_p13)
}
  0x58   : > { %s2511_s8 = sld [smem:[#allocation33_spill]]  ;;  %s1339_s30 = sadd.s32 4294967294, %s2014_s23  }
  0x59   : > { %s40_s28 = sadd.s32 1, %s2006_s21  ;;  %s43_s9 = sadd.s32 1, %s2010_s22 }
  0x5a   : > { %p41_p4 = scmp.ge.s32.totalorder %s40_s28, 2  ;;  %s50_s6 = sadd.s32 1, %s1994_s18 }
  0x5b   : > { %p57_p7 = scmp.ne.s32.totalorder %s1994_s18, %s1990_s17  ;;  %p63_p9 = scmp.ne.s32.totalorder %s1990_s17, %s1986_s16 }
  0x5c   : > { %s2537_s28 = smov (%p41_p4, %s40_s28), 0  ;;  %s2539_s9 = smov (!%p41_p4, %s43_s9), %s2010_s22 }
  0x5d   : > { %2512 = sst [smem:[#allocation24_spill]] %s2537_s28  ;;  %p45_p3 = scmp.ge.s32.totalorder %s2539_s9, 2 }
  0x5e   : > { %1545 = dma.hbm_to_vmem [thread:$0]  (!%p2165_p6), %s2511_s8, 256, %s365_s1, [#allocation12], %s2019_s11, %s2019_s11, %s2020_s24  }
  0x5f   : > { %s47_s1 = ssub.s32 %s2006_s21, %s2537_s28  ;;  %p58_p6 = scmp.eq.s32.totalorder %s2014_s23, 0 }
  0x60   : > { %p48_p5 = scmp.eq.s32.totalorder %s47_s1, 0  ;;  %s2541_s9 = smov (%p45_p3, %s2539_s9), 0 }
  0x61   : > { %p2251_p8 = por %p58_p6, %p57_p7  ;;  %2514 = sst [smem:[#allocation25_spill]] %s2541_s9 }
  0x62   : > { %s2260_s24 = scalar_select %p48_p5, %s1994_s18, %s50_s6  }
  0x63   : > { %p2264_p10 = por %p2148_p1, %p63_p9  ;;  %s241_s2 = smul.u32 %s2006_s21, %s2010_s22 }
  0x64   : > { %s242_s29 = smul.u32 %s2541_s9, %s2537_s28  ;;  %s246_s12 = sadd.s32 1, %s1982_s15 }
  0x65   : > { %p256_p11 = scmp.ne.s32.totalorder %s1982_s15, %s1978_s14  ;;  %p262_p12 = scmp.ne.s32.totalorder %s1978_s14, %s1974_s13 }
  0x66   : > { %s243_s4 = ssub.s32 %s241_s2, %s242_s29  ;;  %p263_p0 = scmp.eq.s32.totalorder %s1339_s30, 3 }
  0x67   : > { %p244_p13 = scmp.eq.s32.totalorder %s243_s4, 0  ;;  %p2279_p4 = por %p2152_p2, %p256_p11 }
  0x68   : > { %p2283_p7 = por %p263_p0, %p262_p12  ;;  %p1559_p6 = scmp.lt.s32.totalorder %s2014_s23, 4 }
  0x69   : > { %s2289_s1 = scalar_select %p244_p13, %s1982_s15, %s246_s12  }
  0x6a   : > { %s2517_s6 = scalar_select %p2283_p7, 1, 0 }
  0x6b   : > { %s378_s3 = sand.u32 1, %s1994_s18   ;;  %s1348_s5 = sshll.u32 %s2006_s21, 6 }
  0x6c   : > { %s1347_s7 = sshll.u32 %s378_s3, 2  ;;  %s387_s30 = scalar_lea.hbm %s2473_s0, %s1348_s5 }
  0x6d   : > { %s382_s2 = scalar_lea.vmem [#allocation2], %s1347_s7  ;;  %p2298_p3 = pnand %p1559_p6, %p2251_p8 }
  0x6e   : > { %s389_s29 = sshll.u32 %s382_s2, 4  ;;  %s379_s28 = scalar_lea.sflag [#allocation3], %s378_s3  ;;  %s390_s29 = int_to_ptr.vmem [resolvable:$true] %s389_s29 }
  0x6f   : > { %p1828_p5 = pneg %p2298_p3  ;;  %s1839_s12 = scalar_lea.vmem %s390_s29, 64 }
  0x70   : > { %p1840_p9 = scmp.ne.s32.totalorder %s390_s29, %s1839_s12  ;;  %s2023_s22 = smov [#allocation2]  }
  0x71   : > { %s1844_s21 = sshll.u32 %s2023_s22, 4  ;;  %s1845_s21 = int_to_ptr.vmem [resolvable:$false] %s1844_s21 }
  0x72   : > { %p1842_p11 = pnand %p1840_p9, %p1828_p5  ;;  %s1846_s5 = scalar_lea.vmem %s1845_s21, 128 }
  0x73   : > { %p1847_p0 = scmp.lt.s32.totalorder %s390_s29, %s1845_s21  ;;  %p1848_p13 = scmp.lt.s32.totalorder %s1846_s5, %s1839_s12 }
  0x74   : > { %p1843_p12 = pneg %p1842_p11 }
  0x75   : > { %p1849_p7 = por %p1848_p13, %p1847_p0 }
  0x77   : > { %p1850_p8 = pnand %p1849_p7, %p1843_p12 }
  0x79   : > { %1853 = shalt.err (!%p1850_p8)
}
  0x7a   : > { %1549 = dma.hbm_to_vmem [thread:$0]  (!%p2298_p3), %s387_s30, 64, %s390_s29, %s379_s28  }
  0x7b   : > { %p2519_p6 = scmp.ne.s32.totalorder %s2504_s27, 0 }
  0x7c   : > { %s400_s3 = sand.u32 (!%p2519_p6), 1, %s1990_s17  }
  0x7d   : > { %398 = sbr.rel (%p2519_p6) target bundleno = 1796 (0x704), region = 56  ;;  %s1350_s7 = sshll.u32 (!%p2519_p6), %s400_s3, 2 }
  0x7e   : > { %s401_s8 = scalar_lea.sflag (!%p2519_p6), [#allocation3], %s400_s3  ;;  %s404_s9 = scalar_lea.vmem (!%p2519_p6), [#allocation2], %s1350_s7 }
  0x82   : > { %1949 = dma.done.wait (%p2264_p10), %s401_s8, 64  }
  0x83   : > { %1951 = vsyncadd (%p2264_p10), %s401_s8, 4294967232 }
  0x84   : > { %1953 = dma.done.wait (%p2148_p1), [#allocation6], 512  }
  0x85   : > { %1955 = vsyncadd (%p2148_p1), [#allocation6], 4294966784 }
  0x86   : > { %1957 = dma.done.wait (%p2148_p1), [#allocation9], 512  }
  0x87   : > { %1959 = vsyncadd (%p2148_p1), [#allocation9], 4294966784 }
  0x88   : > { %1961 = dma.done.wait (%p2148_p1), [#allocation12], 256  }
  0x89   : > { %1963 = vsyncadd (%p2148_p1), [#allocation12], 4294967040  ;;  %s456_s21 = sand.u32 1, %s1978_s14   ;;  %p464_p10 = scmp.eq.s32.totalorder %s2002_s20, 0  ;;  %v2332_v0 = vld [vmem:[%s404_s9] sm:$0xf] }
  0x8a   : > { %s2329_s22 = sshll.u32 %s456_s21, 3  ;;  %p465_p7 = scmp.eq.s32.totalorder %s1998_s19, 0 }
  0x8b   : > { %s458_s27 = scalar_lea.vmem [#allocation13], %s2329_s22 }
  0x8c   : > { %p466_p3 = pnand %p465_p7, %p464_p10 }
  0x8e   : > { %469 = sbr.rel (%p466_p3) target bundleno = 149 (0x95), region = 84 }
  0x93   : > { %vm470_vm0 = vcmask 64512   ;;  %v2024_v1 = vmov 0.0  }
  0x94   : > { %471 = vst.msk [vmem:[#allocation14] sm:$0xff] %vm470_vm0, %v2024_v1  ;;  %472 = vst.msk [vmem:[#allocation14 + $0x8] sm:$0xff] %vm470_vm0, %v2024_v1 }
  0x95 PF: > { %p1357_p1 = scmp.ne.s32.totalorder %s2002_s20, 0 }
  0x96   : > { %s2520_s11 = sld [smem:[#allocation27_spill]] (!%p1357_p1)  ;;  %s2027_s29 = smov (!%p1357_p1), 96  }
  0x97   : > { %475 = sbr.rel (%p1357_p1) target bundleno = 1108 (0x454), region = 88  ;;  %s2521_s2 = sld [smem:[#allocation29_spill]] (!%p1357_p1) }
  0x9c   : > { %v1674_v2 = vld [vmem:[#allocation5 + $0x8] sm:$0xff]   ;;  %v2025_v3 = vmov 0.0   ;;  %v1675_v4 = vld [vmem:[#allocation7 + $0x8] sm:$0xff]   ;;  %v1676_v5 = vld [vmem:[#allocation5] sm:$0xff]   ;;  %vm2026_vm1 = vmmov 0   ;;  %vm499_vm2 = vcmask 261120  }
  0x9d   : > { %1418 = vmatprep.subr.bf16.mxu0 %v2025_v3  ;;  %1426 = vmatprep.subr.bf16.mxu1 %v2025_v3  ;;  %v1677_v6 = vld [vmem:[#allocation7] sm:$0xff]   ;;  %v1678_v7 = vld [vmem:[#allocation10 + $0x8] sm:$0xff]   ;;  %v1680_v18 = vld [vmem:[#allocation11 + $0x8] sm:$0xff]   ;;  %vm896_vm3 = vcmask 523520   ;;  %vm894_vm4 = vcmask 64512  }
  0x9e   : > { %1419 = vmatpush3.bf16.msra.mxu0 %v1674_v2  ;;  %1422 = vmatprep.mubr.msk.bf16.mxu0 %vm2026_vm1, %v2025_v3  ;;  %v1679_v8 = vld [vmem:[#allocation10] sm:$0xff]   ;;  %v1358_v9 = vld [vmem:[%s2520_s11] ss:$0 sm:$0xff]  ;;  %v1681_v25 = vld [vmem:[#allocation11] sm:$0xff]  }
  0x9f   : > { %1427 = vmatpush3.bf16.msra.mxu1 %v1675_v4  ;;  %1420 = vmatprep.subr.bf16.mxu0 %v2025_v3  ;;  %v1362_v10 = vld [vmem:[%s2521_s2] ss:$0 sm:$0xff] }
  0xa0   : > { %1428 = vmatprep.subr.bf16.mxu1 %v2025_v3  ;;  %1430 = vmatprep.mubr.msk.bf16.mxu1 %vm2026_vm1, %v2025_v3 }
  0xa2   : > { %1421 = vmatpush3.bf16.msra.mxu0 %v1676_v5 }
  0xa3   : > { %1429 = vmatpush3.bf16.msra.mxu1 %v1677_v6  ;;  %1434 = vmatprep.subr.bf16.mxu0 %v2025_v3 }
  0xa4   : > { %1442 = vmatprep.subr.bf16.mxu1 %v2025_v3 }
  0xa5   : > { %1423 = vmatmul.mubr.msk.bf16.vlgmr.msra.gmra.mxu0 %vm499_vm2, %v2332_v0 }
  0xa6   : > { %1431 = vmatmul.mubr.msk.bf16.vlgmr.msra.gmra.mxu1 %vm499_vm2, %v2332_v0  ;;  %1435 = vmatpush3.bf16.msra.mxu0 %v1678_v7 }
  0xa7   : > { %1443 = vmatpush3.bf16.msra.mxu1 %v1678_v7  ;;  %1436 = vmatprep.subr.bf16.mxu0 %v2025_v3 }
  0xa8   : > { %1444 = vmatprep.subr.bf16.mxu1 %v2025_v3  ;;  %1438 = vmatprep.mubr.msk.bf16.mxu0 %vm2026_vm1, %v2025_v3 }
  0xa9   : > { %1446 = vmatprep.mubr.msk.bf16.mxu1 %vm2026_vm1, %v2025_v3 }
  0xaa   : > { %1437 = vmatpush3.bf16.msra.mxu0 %v1679_v8 }
  0xab   : > { %1445 = vmatpush3.bf16.msra.mxu1 %v1679_v8  ;;  %1450 = vmatprep.subr.bf16.mxu0 %v2025_v3 }
  0xac   : > { %1458 = vmatprep.subr.bf16.mxu1 %v2025_v3 }
 0x165   : > { %v537_v11 = vpop.f32.mrf.mxu0 }
 0x166   : > { %v538_v12 = vadd.f32 %v1358_v9, %v537_v11  ;;  %v600_v13 = vpop.f32.mrf.mxu1 }
 0x167   : > { %v601_v14 = vadd.f32 %v1362_v10, %v600_v13  ;;  %v1424_v15 = vpop.f32.mrf.mxu0 }
 0x168   : > { %v606_v16 = vpack.c.bf16 %v538_v12, %v538_v12  ;;  %v1432_v17 = vpop.f32.mrf.mxu1  ;;  %v710_v21 = vmul.f32 %v538_v12, %v538_v12 }
 0x169   : > { %v666_v19 = vpack.c.bf16 %v601_v14, %v601_v14  ;;  %v540_v20 = vpop.f32.mrf.mxu0  ;;  %v772_v26 = vmul.f32 %v601_v14, %v601_v14 }
 0x16a   : > { %v603_v22 = vpop.f32.mrf.mxu1  ;;  %1439 = vmatmul.mubr.msk.bf16.vlgmr.msra.gmra.mxu0 %vm499_vm2, %v606_v16  ;;  %v711_v27 = vpack.c.bf16 %v710_v21, %v710_v21 }
 0x16b   : > { %1447 = vmatmul.mubr.msk.bf16.vlgmr.msra.gmra.mxu1 %vm499_vm2, %v666_v19  ;;  %1451 = vmatpush3.bf16.msra.mxu0 %v1680_v18  ;;  %v1425_v23 = vpop.f32.mrf.mxu0  ;;  %v773_v28 = vpack.c.bf16 %v772_v26, %v772_v26 }
 0x16c   : > { %v1433_v24 = vpop.f32.mrf.mxu1  ;;  %1459 = vmatpush3.bf16.msra.mxu1 %v1680_v18  ;;  %1462 = vmatprep.mubr.msk.bf16.mxu1 %vm2026_vm1, %v2025_v3 }
 0x16d   : > { %1460 = vmatprep.subr.bf16.mxu1 %v2025_v3  ;;  %1452 = vmatprep.subr.bf16.mxu0 %v2025_v3 }
 0x16e   : > { %1454 = vmatprep.mubr.msk.bf16.mxu0 %vm2026_vm1, %v2025_v3 }
 0x16f   : > { %1453 = vmatpush3.bf16.msra.mxu0 %v1681_v25 }
 0x170   : > { %1461 = vmatpush3.bf16.msra.mxu1 %v1681_v25  ;;  %1466 = vmatprep.subr.bf16.mxu0 %v2025_v3 }
 0x171   : > { %1472 = vmatprep.subr.bf16.mxu1 %v2025_v3 }
 0x172   : > { %1455 = vmatmul.mubr.msk.bf16.vlgmr.msra.gmra.mxu0 %vm499_vm2, %v711_v27 }
 0x173   : > { %1463 = vmatmul.mubr.msk.bf16.vlgmr.msra.gmra.mxu1 %vm499_vm2, %v773_v28  ;;  %1468 = vmatprep.mubr.msk.bf16.mxu0 %vm2026_vm1, %v2025_v3 }
 0x174   : > { %1474 = vmatprep.mubr.msk.bf16.mxu1 %vm2026_vm1, %v2025_v3 }
 0x22a   : > { %v660_v29 = vpop.f32.mrf.mxu0 }
 0x22b   : > { %v704_v30 = vpop.f32.mrf.mxu1  ;;  %v897_v31 = vsel %vm896_vm3, %v660_v29, -inf  ;;  %v818_v35 = vsel %vm499_vm2, %v660_v29, -inf }
 0x22c   : > { %v821_v32 = vsel %vm499_vm2, %v704_v30, -inf  ;;  %898 = vmax.xlane.f32.xlu1 %v897_v31  ;;  %v1440_v33 = vpop.f32.mrf.mxu0  ;;  %v900_v38 = vsel %vm896_vm3, %v704_v30, -inf }
 0x22d   : > { %822 = vmax.xlane.f32.xlu0 %v821_v32  ;;  %v1448_v34 = vpop.f32.mrf.mxu1 }
 0x22e   : > { %v663_v36 = vpop.f32.mrf.mxu0 }
 0x22f   : > { %v707_v37 = vpop.f32.mrf.mxu1  ;;  %v844_v36 = vld [vmem:[#allocation14] sm:$0xff] }
 0x230   : > { %819 = vmax.xlane.f32.xlu1 %v818_v35  ;;  %v1441_v39 = vpop.f32.mrf.mxu0 }
 0x231   : > { %901 = vmax.xlane.f32.xlu0 %v900_v38  ;;  %v1449_v40 = vpop.f32.mrf.mxu1 }
 0x232   : > { %v765_v41 = vpop.f32.mrf.mxu0 }
 0x233   : > { %v811_v42 = vpop.f32.mrf.mxu1  ;;  %v771_v43 = vmul.f32 0.125, %v765_v41 }
 0x234   : > { %v817_v44 = vmul.f32 0.125, %v811_v42  ;;  %v1456_v45 = vpop.f32.mrf.mxu0  ;;  %v922_v42 = vld [vmem:[#allocation14 + $0x8] sm:$0xff] }
 0x235   : > { %v1464_v46 = vpop.f32.mrf.mxu1  ;;  %v831_v47 = vsub.f32 %v660_v29, %v771_v43 }
 0x236   : > { %v837_v48 = vsub.f32 %v704_v30, %v817_v44  ;;  %v768_v49 = vpop.f32.mrf.mxu0 }
 0x237   : > { %v814_v50 = vpop.f32.mrf.mxu1 }
 0x238   : > { %v1457_v51 = vpop.f32.mrf.mxu0 }
 0x239   : > { %v1465_v52 = vpop.f32.mrf.mxu1 }
 0x2b5   : > { %v899_v53 = vpop.xlane.xlu1 %898 }
 0x2b6   : > { %v823_v54 = vpop.xlane.xlu0 %822  ;;  %v910_v55 = vsub.f32 %v831_v47, %v899_v53 }
 0x2b7   : > { %v824_v56 = vrot.slane %v823_v54, 4 }
 0x2b8   : > { %v911_v57 = vmul.f32 1.442695, %v910_v55 }
 0x2b9   : > { %v825_v58 = vmax.f32 %v823_v54, %v824_v56  ;;  %v820_v11 = vpop.xlane.xlu1 %819 }
 0x2ba   : > { %1682 = vpow2.f32 %v911_v57  ;;  %v902_v59 = vpop.xlane.xlu0 %901  ;;  %v832_v12 = vsub.f32 %v831_v47, %v820_v11 }
 0x2bb   : > { %v826_v60 = vrot.slane %v825_v58, 2  ;;  %v903_v61 = vrot.slane %v902_v59, 4 }
 0x2bc   : > { %v833_v15 = vmul.f32 1.442695, %v832_v12 }
 0x2bd   : > { %v904_v62 = vmax.f32 %v902_v59, %v903_v61  ;;  %v827_v63 = vmax.f32 %v825_v58, %v826_v60 }
 0x2bf   : > { %v905_v1 = vrot.slane %v904_v62, 2  ;;  %v828_v2 = vrot.slane %v827_v63, 1 }
 0x2c1   : > { %v829_v3 = vmax.f32 %v827_v63, %v828_v2  ;;  %v906_v4 = vmax.f32 %v904_v62, %v905_v1 }
 0x2c3   : > { %1498 = vpush %v829_v3  ;;  %v907_v5 = vrot.slane %v906_v4, 1 }
 0x2c5   : > { %v908_v6 = vmax.f32 %v906_v4, %v907_v5 }
 0x2c7   : > { %v1683_v7 = vpop.eup %1682  ;;  %1500 = vpush %v908_v6 }
 0x2c8   : > { %v913_v8 = vadd.f32 0.0001, %v1683_v7 }
 0x2ca   : > { %v914_v9 = vmul.f32 0.17677669, %v913_v8 }
 0x2cc   : > { %v923_v10 = vpack.c.bf16 %v914_v9, %v914_v9 }
 0x2ce   : > { %926 = vrot.lane.b32.xlu1 %v923_v10, %s2027_s29 }
 0x2f4   : > { %s1499_s4 = spop %1498 }
 0x2f5   : > { %v838_v13 = vstv %s1499_s4 }
 0x2f6   : > { %v839_v14 = vsub.f32 %v837_v48, %v838_v13 }
 0x2f8   : > { %v840_v16 = vmul.f32 1.442695, %v839_v14  ;;  %s1501_s12 = spop %1500 }
 0x2f9   : > { %v915_v17 = vstv %s1501_s12 }
 0x2fa   : > { %1684 = vpow2.f32 %v840_v16  ;;  %v916_v18 = vsub.f32 %v837_v48, %v915_v17 }
 0x2fb   : > { %1686 = vpow2.f32 %v833_v15 }
 0x2fc   : > { %v917_v19 = vmul.f32 1.442695, %v916_v18 }
 0x2fe   : > { %1688 = vpow2.f32 %v917_v19 }
 0x307   : > { %v1685_v20 = vpop.eup %1684 }
 0x308   : > { %v842_v21 = vadd.f32 0.0001, %v1685_v20  ;;  %v1687_v22 = vpop.eup %1686 }
 0x309   : > { %v835_v25 = vadd.f32 0.0001, %v1687_v22 }
 0x30a   : > { %v843_v23 = vmul.f32 0.17677669, %v842_v21 }
 0x30b   : > { %v1689_v24 = vpop.eup %1688  ;;  %v836_v30 = vmul.f32 0.17677669, %v835_v25 }
 0x30c   : > { %v846_v26 = vpack.c.bf16 %v843_v23, %v843_v23  ;;  %v919_v27 = vadd.f32 0.0001, %v1689_v24 }
 0x30d   : > { %v845_v32 = vpack.c.bf16 %v836_v30, %v836_v30 }
 0x30e   : > { %v851_v28 = vsel %vm499_vm2, %v846_v26, 0  ;;  %v920_v29 = vmul.f32 0.17677669, %v919_v27 }
 0x30f   : > { %1467 = vmatpush3.bf16.xpose.msra.mxu0 %v851_v28 }
 0x310   : > { %v924_v31 = vpack.c.bf16 %v920_v29, %v920_v29 }
 0x312   : > { %929 = vrot.lane.b32.xlu0 %v924_v31, %s2027_s29 }
 0x316   : > { %1469 = vmatmul.mubr.msk.bf16.vlgmr.msra.gmra.mxu0 %vm499_vm2, %v845_v32 }
 0x340   : > { %v927_v35 = vpop.permute.xlu1 %926 }
 0x384   : > { %v930_v33 = vpop.permute.xlu0 %929 }
 0x385   : > { %v935_v34 = vsel %vm499_vm2, %v930_v33, 0 }
 0x386   : > { %1473 = vmatpush3.bf16.xpose.msra.mxu1 %v935_v34 }
 0x38d   : > { %1475 = vmatmul.mubr.msk.bf16.vlgmr.msra.gmra.mxu1 %vm499_vm2, %v927_v35 }
 0x3d6   : > { %v887_v37 = vpop.f32.mrf.mxu0 }
 0x3d7   : > { %v893_v38 = vadd.f32 %v887_v37, %v844_v36 }
 0x3d8   : > { %v1470_v39 = vpop.f32.mrf.mxu0 }
 0x3d9   : > { %895 = vst.msk [vmem:[#allocation14] sm:$0xff] %vm894_vm4, %v893_v38 }
 0x3da   : > { %v890_v40 = vpop.f32.mrf.mxu0 }
 0x3dc   : > { %v1471_v41 = vpop.f32.mrf.mxu0 }
 0x44d   : > { %v971_v43 = vpop.f32.mrf.mxu1 }
 0x44e   : > { %v977_v44 = vadd.f32 %v971_v43, %v922_v42 }
 0x44f   : > { %v1476_v45 = vpop.f32.mrf.mxu1 }
 0x450   : > { %978 = vst.msk [vmem:[#allocation14 + $0x8] sm:$0xff] %vm894_vm4, %v977_v44 }
 0x451   : > { %v974_v46 = vpop.f32.mrf.mxu1 }
 0x453   : > { %v1477_v47 = vpop.f32.mrf.mxu1 }
 0x454 PF: > { %p1376_p5 = scmp.ne.s32.totalorder %s2002_s20, 1 }
 0x455   : > { %s2522_s7 = sld [smem:[#allocation31_spill]] (!%p1376_p5)  ;;  %s2030_s8 = smov (!%p1376_p5), 112  }
 0x456   : > { %982 = sbr.rel (%p1376_p5) target bundleno = 1750 (0x6d6), region = 92  ;;  %s2031_s9 = smov (!%p1376_p5), 16  }
 0x45b   : > { %v1690_v48 = vld [vmem:[#allocation8 + $0x8] sm:$0xff]   ;;  %v2028_v49 = vmov 0.0   ;;  %v1691_v50 = vld [vmem:[#allocation8] sm:$0xff]   ;;  %vm2029_vm5 = vmmov 0   ;;  %vm1051_vm6 = vcmask 64512   ;;  %vm1006_vm7 = vcmask 261120  }
 0x45c   : > { %1478 = vmatprep.subr.bf16.mxu0 %v2028_v49  ;;  %1486 = vmatprep.subr.bf16.mxu1 %v2028_v49  ;;  %v1050_v51 = vld [vmem:[#allocation14] sm:$0xff]  ;;  %v1107_v52 = vld [vmem:[#allocation14 + $0x8] sm:$0xff]  ;;  %v1377_v57 = vld [vmem:[%s2522_s7] ss:$0 sm:$0xff]  ;;  %vm1062_vm8 = vcmask 1043456   ;;  %vm1167_vm9 = vcmask 130048  }
 0x45d   : > { %1479 = vmatpush3.bf16.msra.mxu0 %v1690_v48  ;;  %1482 = vmatprep.mubr.msk.bf16.mxu0 %vm2029_vm5, %v2028_v49  ;;  %v1052_v53 = vsel %vm1051_vm6, %v1050_v51, 0.0  ;;  %v1108_v54 = vsel %vm1051_vm6, %v1107_v52, 0.0 }
 0x45e   : > { %1480 = vmatprep.subr.bf16.mxu0 %v2028_v49  ;;  %1488 = vmatprep.mubr.msk.bf16.mxu1 %vm2029_vm5, %v2028_v49 }
 0x45f   : > { %1053 = vadd.xlane.f32.xlu0 %v1052_v53 }
 0x461   : > { %1481 = vmatpush3.bf16.msra.mxu0 %v1691_v50 }
 0x463   : > { %1109 = vadd.xlane.f32.xlu0 %v1108_v54 }
 0x464   : > { %1483 = vmatmul.mubr.msk.bf16.vlgmr.msra.gmra.mxu0 %vm1006_vm7, %v2332_v0 }
 0x4e8   : > { %v1054_v55 = vpop.xlane.xlu0 %1053 }
 0x4e9   : > { %1692 = vrcp.f32 %v1054_v55 }
 0x4ec   : > { %v1110_v3 = vpop.xlane.xlu0 %1109 }
 0x4ed   : > { %1694 = vrcp.f32 %v1110_v3 }
 0x4f6   : > { %v1693_v56 = vpop.eup %1692 }
 0x4f7   : > { %v1056_v60 = vmul.f32 %v1693_v56, %v1050_v51 }
 0x4f9   : > { %v1057_v2 = vpack.c.bf16 %v1056_v60, %v1056_v60 }
 0x4fa   : > { %v1695_v4 = vpop.eup %1694 }
 0x4fb   : > { %v1112_v5 = vmul.f32 %v1695_v4, %v1107_v52 }
 0x4fd   : > { %v1113_v8 = vpack.c.bf16 %v1112_v5, %v1112_v5 }
 0x524   : > { %v1044_v58 = vpop.f32.mrf.mxu0 }
 0x525   : > { %v1045_v59 = vadd.f32 %v1377_v57, %v1044_v58 }
 0x526   : > { %v1484_v61 = vpop.f32.mrf.mxu0 }
 0x527   : > { %v1058_v62 = vpack.c.bf16 %v1045_v59, %v1045_v59 }
 0x528   : > { %v1047_v63 = vpop.f32.mrf.mxu0 }
 0x529   : > { %1115 = vrot.lane.b32.xlu1 %v1058_v62, %s2030_s8  ;;  %v1064_v1 = vsel %vm1062_vm8, %v1058_v62, 0 }
 0x52a   : > { %v1485_v0 = vpop.f32.mrf.mxu0  ;;  %1487 = vmatpush3.bf16.msra.mxu1 %v1064_v1 }
 0x52b   : > { %1492 = vmatprep.subr.bf16.mxu1 %v2028_v49 }
 0x52d   : > { %1489 = vmatmul.mubr.msk.bf16.vlgmr.msra.gmra.mxu1 %vm1051_vm6, %v1057_v2 }
 0x52e   : > { %1494 = vmatprep.mubr.msk.bf16.mxu1 %vm2029_vm5, %v2028_v49 }
 0x59b   : > { %v1116_v6 = vpop.permute.xlu1 %1115 }
 0x59c   : > { %v1121_v7 = vsel %vm1062_vm8, %v1116_v6, 0 }
 0x59d   : > { %1493 = vmatpush3.bf16.msra.mxu1 %v1121_v7 }
 0x5a0   : > { %1495 = vmatmul.mubr.msk.bf16.vlgmr.msra.gmra.mxu1 %vm1051_vm6, %v1113_v8 }
 0x5ed   : > { %v1100_v9 = vpop.f32.mrf.mxu1 }
 0x5ef   : > { %v1490_v10 = vpop.f32.mrf.mxu1 }
 0x5f1   : > { %v1103_v11 = vpop.f32.mrf.mxu1 }
 0x5f3   : > { %v1491_v12 = vpop.f32.mrf.mxu1 }
 0x660   : > { %v1157_v13 = vpop.f32.mrf.mxu1 }
 0x661   : > { %1164 = vrot.lane.b32.xlu1 %v1157_v13, %s2031_s9 }
 0x662   : > { %v1496_v14 = vpop.f32.mrf.mxu1 }
 0x664   : > { %v1160_v15 = vpop.f32.mrf.mxu1 }
 0x666   : > { %v1497_v16 = vpop.f32.mrf.mxu1 }
 0x6d3   : > { %v1165_v17 = vpop.permute.xlu1 %1164 }
 0x6d4   : > { %v1168_v18 = vsel %vm1167_vm9, %v1100_v9, %v1165_v17 }
 0x6d5   : > { %1169 = vst.msk [vmem:[%s458_s27] sm:$0xff] %vm1006_vm7, %v1168_v18 }
 0x6d6 PF: > { %s1178_s25 = smul.u32 %s1998_s19, %s2002_s20  ;;  %s1185_s28 = sshll.u32 %s458_s27, 4  ;;  %s1186_s28 = int_to_ptr.vmem [resolvable:$true] %s1185_s28 }
 0x6d7   : > { %s2523_s2 = sld [smem:[#allocation34_spill]]  ;;  %s1171_s4 = scalar_lea.sflag [#allocation4], %s456_s21 }
 0x6d8   : > { %s1384_s11 = sshll.u32 %s1178_s25, 7  ;;  %s1854_s12 = scalar_lea.vmem %s1186_s28, 128 }
 0x6d9   : > { %p1855_p9 = scmp.ne.s32.totalorder %s1186_s28, %s1854_s12  ;;  %s2032_s5 = smov [#allocation13]  }
 0x6da   : > { %s1858_s3 = sshll.u32 %s2032_s5, 4  ;;  %s1859_s3 = int_to_ptr.vmem [resolvable:$false] %s1858_s3 }
 0x6db   : > { %p1856_p11 = pnand %p1855_p9, %p2279_p4  ;;  %s1860_s7 = scalar_lea.vmem %s1859_s3, 256 }
 0x6dc   : > { %p1861_p0 = scmp.lt.s32.totalorder %s1186_s28, %s1859_s3  ;;  %p1862_p13 = scmp.lt.s32.totalorder %s1860_s7, %s1854_s12 }
 0x6dd   : > { %s1183_s29 = scalar_lea.hbm %s2523_s2, %s1384_s11  ;;  %p1857_p12 = pneg %p1856_p11 }
 0x6de   : > { %p1863_p8 = por %p1862_p13, %p1861_p0 }
 0x6e0   : > { %p1864_p6 = pnand %p1863_p8, %p1857_p12 }
 0x6e2   : > { %1867 = shalt.err (!%p1864_p6)
}
 0x6e3   : > { %s1868_s19 = scalar_lea.hbm %s1183_s29, 128  ;;  %s1872_s22 = scalar_lea.hbm %s2523_s2, 256 }
 0x6e4   : > { %p1869_p10 = scmp.ne.s32.totalorder %s1183_s29, %s1868_s19  ;;  %p1873_p1 = scmp.lt.s32.totalorder %s1183_s29, %s2523_s2 }
 0x6e5   : > { %p1874_p5 = scmp.lt.s32.totalorder %s1872_s22, %s1868_s19 }
 0x6e6   : > { %p1870_p7 = pnand %p1869_p10, %p2279_p4 }
 0x6e7   : > { %p1875_p9 = por %p1874_p5, %p1873_p1 }
 0x6e8   : > { %p1871_p3 = pneg %p1870_p7 }
 0x6ea   : > { %p1876_p11 = pnand %p1875_p9, %p1871_p3 }
 0x6ec   : > { %1879 = shalt.err (!%p1876_p11)
}
 0x6ed   : > { %1524 = dma.vmem_to_hbm [thread:$0]  (%p2279_p4), %s1186_s28, 128, %s1183_s29, %s1171_s4  }
 0x6ee   : > { %s2033_s9 = smov [#allocation14]  }
 0x6ef   : > { %s1195_s25 = sshll.u32 %s2033_s9, 4  ;;  %s1196_s25 = int_to_ptr.vmem [resolvable:$true] %s1195_s25 }
 0x6f0   : > { %s1880_s11 = scalar_lea.vmem %s1196_s25, 256  ;;  %p1887_p8 = scmp.lt.s32.totalorder %s1196_s25, %s1196_s25 }
 0x6f1   : > { %p1881_p12 = scmp.ne.s32.totalorder %s1196_s25, %s1880_s11  ;;  %p1888_p6 = scmp.lt.s32.totalorder %s1880_s11, %s1880_s11 }
 0x6f3   : > { %p1882_p0 = pnand %p1881_p12, %p2152_p2  ;;  %p1889_p10 = por %p1888_p6, %p1887_p8 }
 0x6f5   : > { %p1883_p13 = pneg %p1882_p0 }
 0x6f7   : > { %p1890_p7 = pnand %p1889_p10, %p1883_p13 }
 0x6f9   : > { %1893 = shalt.err (!%p1890_p7)
}
 0x6fa   : > { %s2034_s10 = smov 128   ;;  %s2035_s30 = smov 8  }
 0x6fb   : > { %s2524_s29 = sld [smem:[#allocation35_spill]] }
 0x701   : > { %1526 = dma.vmem_to_hbm [thread:$0]  (%p2152_p2), %s1196_s25, 256, %s2524_s29, [#allocation15], %s2034_s10, %s2034_s10, %s2035_s30  }
 0x702   : > { %1965 = dma.done.wait (%p2152_p2), [#allocation15], 256  }
 0x703   : > { %1967 = vsyncadd (%p2152_p2), [#allocation15], 4294967040 }
 0x704 PF: > { %p1567_p4 = scmp.ge.s32.totalorder %s2014_s23, 2  ;;  %s1214_s4 = sand.u32 1, %s1974_s13  }
 0x705   : > { %p2525_p3 = scmp.ne.s32.totalorder %s2517_s6, 0  ;;  %s1215_s12 = scalar_lea.sflag [#allocation4], %s1214_s4 }
 0x707   : > { %p1551_p1 = pnand %p1567_p4, %p2525_p3 }
 0x709   : > { %p1552_p5 = pneg %p1551_p1 }
 0x70b   : > { %1969 = dma.done.wait (%p1552_p5), %s1215_s12, 128  }
 0x70c   : > { %1971 = vsyncadd (%p1552_p5), %s1215_s12, 4294967168  ;;  %s31_s23 = sadd.s32 1, %s2014_s23   ;;  %s2526_s19 = sld [smem:[#allocation22_spill]] }
 0x70d   : > { %p28_p9 = scmp.ge.s32.totalorder %s31_s23, 6   ;;  %s2527_s20 = sld [smem:[#allocation23_spill]] }
 0x70e   : > { %s2528_s21 = sld [smem:[#allocation24_spill]]  ;;  %s2530_s13 = smov %s1978_s14 }
 0x70f   : > { %s2529_s22 = sld [smem:[#allocation25_spill]]  ;;  %s2531_s14 = smov %s1982_s15 }
 0x710   : > { %s2532_s15 = smov %s2289_s1  ;;  %s2533_s16 = smov %s1990_s17 }
 0x711   : > { %s2534_s17 = smov %s1994_s18  ;;  %s2535_s18 = smov %s2260_s24 }
 0x712   :  { %30 = sbr.rel (!%p28_p9) target bundleno = 24 (0x18), region = 143 }
 0x717   :  { %1220 = vsyncpa [#allocation3], 1 }
 0x718   :  { %1222 = vsyncpa [#allocation3 + $0x1], 1 }
 0x719   :  { %1223 = vsyncpa [#allocation6], 1 }
 0x71a   :  { %1224 = vsyncpa [#allocation9], 1 }
 0x71b   :  { %1225 = vsyncpa [#allocation12], 1 }
 0x71c   :  { %1226 = vsyncpa [#allocation4], 1 }
 0x71d   :  { %1228 = vsyncpa [#allocation4 + $0x1], 1 }
 0x71e   :  { %1229 = vsyncpa [#allocation15], 1 }

</bundles_post_ra>
